<compile_context>
chip_gen: v7x
topology: tpu7x:2x2x1
jax: 0.10.0
libtpu: 0.0.40
codegen_flags: <defaults>
</compile_context>

<pallas_src>
import functools

import jax
import jax.numpy as jnp
from jax.experimental import pallas as pl
from jax.experimental.pallas import tpu as pltpu

D = 768  # BERT hidden size


# ----------------------------------------------------------------------------
# EntModel kernel: scores = protos @ (W @ word_vecs)  -> softmax(dim=0) per token
# ----------------------------------------------------------------------------
def _ent_kernel(protos_ref, w_ref, wordvecs_ref, prob_ref):
    # Reassociation: (protos @ W) @ wv == protos @ (W @ wv); the second form runs the
    # dominant 768x768 matmul once against ALL T tokens (bf16 inputs, f32 accumulate).
    v = jnp.dot(w_ref[...], wordvecs_ref[...],
                preferred_element_type=jnp.float32)                     # (D, T) f32
    scores = jnp.dot(protos_ref[...].astype(jnp.float32), v,
                     preferred_element_type=jnp.float32)                # (3, T) f32
    m = jnp.max(scores, axis=0, keepdims=True)
    e = jnp.exp(scores - m)
    prob_ref[...] = e / jnp.sum(e, axis=0, keepdims=True)               # softmax dim=0


def ent_model(protos, w_ent_bf16, word_vecs):
    """protos: (3,768); w_ent_bf16: (768,768) bf16 (pre-cast once); word_vecs: (768,T).
    Returns (3, T) f32 -- column t is softmax(protos @ W @ word_vecs[:, t])."""
    T = word_vecs.shape[-1]
    protos = protos.reshape(3, D).astype(jnp.bfloat16)
    word_vecs = word_vecs.reshape(D, T).astype(jnp.bfloat16)
    # Everything fits in VMEM (W is 1.1 MiB bf16): no grid, whole arrays, no BlockSpecs.
    return pl.pallas_call(
        _ent_kernel,
        out_shape=jax.ShapeDtypeStruct((3, T), jnp.float32),
    )(protos, w_ent_bf16, word_vecs)


# ----------------------------------------------------------------------------
# RelModel + TriModel fused/batched kernel.
#   One grid step = one support group (K, 768). Both classifier heads share a
#   single (768, 2*H) matmul; per head: softmax(dim=1).mean(0) -> (1, 2).
# ----------------------------------------------------------------------------
def _cls_kernel(n_heads, training, spool_ref, *rest):
    if training:
        mask_ref, w_ref, b_ref, *out_refs = rest
    else:
        mask_ref = None
        w_ref, b_ref, *out_refs = rest

    x = spool_ref[0]                                                    # (K, D) bf16
    if training:
        # F.dropout default p=0.5, inverted scaling 1/(1-p)=2. Elementwise math kept
        # in f32 (v5e has no bf16 VPU); cast to bf16 only at the MXU dot.
        x = (x.astype(jnp.float32) * mask_ref[0].astype(jnp.float32) * 2.0
             ).astype(jnp.bfloat16)

    logits = jnp.dot(x, w_ref[...],
                     preferred_element_type=jnp.float32) + b_ref[...]   # (K, 2H) f32
    for h in range(n_heads):
        lg = logits[:, 2 * h:2 * h + 2]                                 # (K, 2)
        m = jnp.max(lg, axis=1, keepdims=True)
        e = jnp.exp(lg - m)
        p = e / jnp.sum(e, axis=1, keepdims=True)                       # softmax dim=1
        out_refs[h][0] = jnp.mean(p, axis=0, keepdims=True)             # (1, 2)


def classifier_probs(s_pool_groups, w_packed, b_packed, *, training=False,
                     dropout_mask=None):
    """s_pool_groups: (G, K, 768); w_packed: (768, 2*H) bf16 (pre-transposed/packed);
    b_packed: (1, 2*H) f32. Returns a tuple of H arrays, each (G, 2)."""
    G, K, _ = s_pool_groups.shape
    H = w_packed.shape[-1] // 2
    s_pool_groups = s_pool_groups.astype(jnp.bfloat16)

    grp_spec = pl.BlockSpec((1, K, D), lambda g: (g, 0, 0))
    in_specs = [grp_spec]
    operands = [s_pool_groups]
    if training:
        assert dropout_mask is not None
        in_specs.append(grp_spec)
        operands.append(dropout_mask.astype(jnp.bfloat16))
    in_specs += [
        pl.BlockSpec((D, 2 * H), lambda g: (0, 0)),   # weight resident across grid
        pl.BlockSpec((1, 2 * H), lambda g: (0, 0)),   # bias resident across grid
    ]
    operands += [w_packed, b_packed]

    out = pl.pallas_call(
        functools.partial(_cls_kernel, H, training),
        out_shape=tuple(jax.ShapeDtypeStruct((G, 1, 2), jnp.float32)
                        for _ in range(H)),
        grid=(G,),
        in_specs=in_specs,
        out_specs=tuple(pl.BlockSpec((1, 1, 2), lambda g: (g, 0, 0))
                        for _ in range(H)),
        compiler_params=pltpu.CompilerParams(dimension_semantics=("parallel",)),
    )(*operands)
    return tuple(o.reshape(G, 2) for o in out)


# ----------------------------------------------------------------------------
# Parameter init (mirrors the PyTorch __init__ shapes) + one-time packing.
# ----------------------------------------------------------------------------
def init_params(key):
    k1, k2, k3, k4, k5 = jax.random.split(key, 5)
    xavier_std = (2.0 / (D + D)) ** 0.5
    W_ent = jax.random.normal(k1, (D, D), jnp.float32) * xavier_std       # EntModel.W
    rel_w = jax.random.normal(k2, (2, D), jnp.float32) * (1.0 / D ** 0.5) # Linear(768,2)
    rel_b = jax.random.normal(k3, (2,), jnp.float32) * 0.01
    tri_w = jax.random.normal(k4, (2, D), jnp.float32) * (1.0 / D ** 0.5)
    tri_b = jax.random.normal(k5, (2,), jnp.float32) * 0.01
    return W_ent, rel_w, rel_b, tri_w, tri_b


def prepare_params(W_ent, rel_w, rel_b, tri_w, tri_b):
    # Done ONCE at init: transpose + cast + pack, so no per-call host-side
    # transpose/cast ops sit in front of the kernels.
    w_ent_bf16 = W_ent.astype(jnp.bfloat16)                                       # (768, 768)
    w_packed = jnp.concatenate([rel_w.T, tri_w.T], axis=1).astype(jnp.bfloat16)   # (768, 4)
    b_packed = jnp.concatenate([rel_b, tri_b]).reshape(1, 4).astype(jnp.float32)  # (1, 4)
    return w_ent_bf16, w_packed, b_packed


if __name__ == "__main__":
    key = jax.random.PRNGKey(0)
    W_ent, rel_w, rel_b, tri_w, tri_b = init_params(key)
    w_ent_bf16, w_packed, b_packed = prepare_params(W_ent, rel_w, rel_b, tri_w, tri_b)

    # Small shapes consistent with the module: N-way=2, K-shot=4, hidden=768, T=8 tokens.
    N, K, T = 2, 4, 8
    kk = jax.random.split(jax.random.PRNGKey(1), 4)
    s_pool = jax.random.normal(kk[0], (N, K, D), jnp.float32)    # pooled BERT outputs
    protos = jax.random.normal(kk[1], (3, D), jnp.float32)       # none/head/tail prototypes
    word_vecs = jax.random.normal(kk[2], (D, T), jnp.float32)    # T query token vectors

    # Eval: ONE kernel launch covers all N groups AND both rel/tri heads.
    # TODO(synk): in the full Model.forward, TriModel runs on a data-dependent
    # new_s_pool from recombine_fusion; here both heads are demonstrated on s_pool.
    rel_probs, tri_probs = classifier_probs(s_pool, w_packed, b_packed, training=False)

    # Training path: dropout keep-mask generated host-side, applied inside the kernel.
    keep = jax.random.bernoulli(kk[3], 0.5, s_pool.shape)
    rel_probs_tr, tri_probs_tr = classifier_probs(
        s_pool, w_packed, b_packed, training=True, dropout_mask=keep)

    # EntModel: all T query tokens of one episode in a single launch.
    ent_prob = ent_model(protos, w_ent_bf16, word_vecs)          # (3, T)

    jax.block_until_ready((rel_probs, tri_probs, rel_probs_tr, tri_probs_tr, ent_prob))

    # Sanity: every softmax output sums to 1 (bf16 inputs -> ~1e-3 tolerance).
    assert jnp.allclose(jnp.sum(rel_probs, axis=-1), 1.0, atol=1e-3)
    assert jnp.allclose(jnp.sum(tri_probs, axis=-1), 1.0, atol=1e-3)
    assert jnp.allclose(jnp.sum(rel_probs_tr, axis=-1), 1.0, atol=1e-3)
    assert jnp.allclose(jnp.sum(tri_probs_tr, axis=-1), 1.0, atol=1e-3)
    assert jnp.allclose(jnp.sum(ent_prob, axis=0), 1.0, atol=1e-3)
    print("KERNEL_OK")
</pallas_src>

<mosaic_0001>
module attributes {stable_mosaic.version = 11 : i64} {
  func.func @_cls_kernel(%arg0: i32, %arg1: memref<1x4x768xbf16, #tpu.memory_space<vmem>>, %arg2: memref<768x4xbf16, #tpu.memory_space<vmem>>, %arg3: memref<1x4xf32, #tpu.memory_space<vmem>>, %arg4: memref<1x1x2xf32, #tpu.memory_space<vmem>>, %arg5: memref<1x1x2xf32, #tpu.memory_space<vmem>>) attributes {dimension_semantics = [#tpu.dimension_semantics<parallel>], iteration_bounds = array<i64: 2>, scalar_prefetch = 0 : i64, scratch_operands = 0 : i64, tpu.core_type = #tpu.core_type<tc>, window_params = [{transform_indices = @transform_0, window_bounds = array<i64: 1, 4, 768>}, {pipeline_mode = #tpu.pipeline_mode<synchronous>, transform_indices = @transform_1, window_bounds = array<i64: 768, 4>}, {pipeline_mode = #tpu.pipeline_mode<synchronous>, transform_indices = @transform_2, window_bounds = array<i64: 1, 4>}, {transform_indices = @transform_3, window_bounds = array<i64: 1, 1, 2>}, {transform_indices = @transform_4, window_bounds = array<i64: 1, 1, 2>}]} {
    %c0 = arith.constant 0 : index
    %c0_0 = arith.constant 0 : index
    %c0_1 = arith.constant 0 : index
    %0 = vector.load %arg1[%c0, %c0_0, %c0_1] : memref<1x4x768xbf16, #tpu.memory_space<vmem>>, vector<1x4x768xbf16>
    %1 = vector.shape_cast %0 : vector<1x4x768xbf16> to vector<4x768xbf16>
    %c0_2 = arith.constant 0 : index
    %c0_3 = arith.constant 0 : index
    %2 = vector.load %arg2[%c0_2, %c0_3] : memref<768x4xbf16, #tpu.memory_space<vmem>>, vector<768x4xbf16>
    %cst = arith.constant dense<0.000000e+00> : vector<4x4xf32>
    %3 = tpu.matmul %1, %2, %cst {dimension_numbers = #tpu.dot_dimension_numbers<[1], [0], [0], [1], [0, 0, 1, 1], [], []>} : vector<4x768xbf16>, vector<768x4xbf16>, vector<4x4xf32> -> vector<4x4xf32>
    %c0_4 = arith.constant 0 : index
    %c0_5 = arith.constant 0 : index
    %4 = vector.load %arg3[%c0_4, %c0_5] : memref<1x4xf32, #tpu.memory_space<vmem>>, vector<1x4xf32>
    %5 = vector.broadcast %4 : vector<1x4xf32> to vector<4x4xf32>
    %6 = arith.addf %3, %5 : vector<4x4xf32>
    %7 = vector.extract_strided_slice %6 {offsets = [0, 0], sizes = [4, 2], strides = [1, 1]} : vector<4x4xf32> to vector<4x2xf32>
    %cst_6 = arith.constant dense<0xFF800000> : vector<4xf32>
    %8 = vector.multi_reduction <maximumf>, %7, %cst_6 [1] : vector<4x2xf32> to vector<4xf32>
    %9 = vector.shape_cast %8 : vector<4xf32> to vector<4x1xf32>
    %10 = vector.broadcast %9 : vector<4x1xf32> to vector<4x2xf32>
    %11 = arith.subf %7, %10 : vector<4x2xf32>
    %12 = math.exp %11 : vector<4x2xf32>
    %cst_7 = arith.constant dense<0.000000e+00> : vector<4xf32>
    %13 = vector.multi_reduction <add>, %12, %cst_7 [1] : vector<4x2xf32> to vector<4xf32>
    %14 = vector.shape_cast %13 : vector<4xf32> to vector<4x1xf32>
    %15 = vector.broadcast %14 : vector<4x1xf32> to vector<4x2xf32>
    %16 = arith.divf %12, %15 : vector<4x2xf32>
    %cst_8 = arith.constant dense<0.000000e+00> : vector<2xf32>
    %17 = vector.multi_reduction <add>, %16, %cst_8 [0] : vector<4x2xf32> to vector<2xf32>
    %18 = vector.shape_cast %17 : vector<2xf32> to vector<1x2xf32>
    %cst_9 = arith.constant 4.000000e+00 : f32
    %19 = vector.broadcast %cst_9 : f32 to vector<1x2xf32>
    %20 = arith.divf %18, %19 : vector<1x2xf32>
    %c0_10 = arith.constant 0 : index
    %c0_11 = arith.constant 0 : index
    %c0_12 = arith.constant 0 : index
    %21 = vector.load %arg4[%c0_10, %c0_11, %c0_12] : memref<1x1x2xf32, #tpu.memory_space<vmem>>, vector<1x1x2xf32>
    %22 = vector.shape_cast %21 : vector<1x1x2xf32> to vector<1x2xf32>
    %23 = vector.shape_cast %20 : vector<1x2xf32> to vector<1x1x2xf32>
    tpu.vector_store %arg4[%c0_10, %c0_11, %c0_12], %23 {strides = array<i32>} : memref<1x1x2xf32, #tpu.memory_space<vmem>>, vector<1x1x2xf32>,
    %24 = vector.extract_strided_slice %6 {offsets = [0, 2], sizes = [4, 2], strides = [1, 1]} : vector<4x4xf32> to vector<4x2xf32>
    %cst_13 = arith.constant dense<0xFF800000> : vector<4xf32>
    %25 = vector.multi_reduction <maximumf>, %24, %cst_13 [1] : vector<4x2xf32> to vector<4xf32>
    %26 = vector.shape_cast %25 : vector<4xf32> to vector<4x1xf32>
    %27 = vector.broadcast %26 : vector<4x1xf32> to vector<4x2xf32>
    %28 = arith.subf %24, %27 : vector<4x2xf32>
    %29 = math.exp %28 : vector<4x2xf32>
    %cst_14 = arith.constant dense<0.000000e+00> : vector<4xf32>
    %30 = vector.multi_reduction <add>, %29, %cst_14 [1] : vector<4x2xf32> to vector<4xf32>
    %31 = vector.shape_cast %30 : vector<4xf32> to vector<4x1xf32>
    %32 = vector.broadcast %31 : vector<4x1xf32> to vector<4x2xf32>
    %33 = arith.divf %29, %32 : vector<4x2xf32>
    %cst_15 = arith.constant dense<0.000000e+00> : vector<2xf32>
    %34 = vector.multi_reduction <add>, %33, %cst_15 [0] : vector<4x2xf32> to vector<2xf32>
    %35 = vector.shape_cast %34 : vector<2xf32> to vector<1x2xf32>
    %cst_16 = arith.constant 4.000000e+00 : f32
    %36 = vector.broadcast %cst_16 : f32 to vector<1x2xf32>
    %37 = arith.divf %35, %36 : vector<1x2xf32>
    %c0_17 = arith.constant 0 : index
    %c0_18 = arith.constant 0 : index
    %c0_19 = arith.constant 0 : index
    %38 = vector.load %arg5[%c0_17, %c0_18, %c0_19] : memref<1x1x2xf32, #tpu.memory_space<vmem>>, vector<1x1x2xf32>
    %39 = vector.shape_cast %38 : vector<1x1x2xf32> to vector<1x2xf32>
    %40 = vector.shape_cast %37 : vector<1x2xf32> to vector<1x1x2xf32>
    tpu.vector_store %arg5[%c0_17, %c0_18, %c0_19], %40 {strides = array<i32>} : memref<1x1x2xf32, #tpu.memory_space<vmem>>, vector<1x1x2xf32>,
    return
  }
  func.func @transform_0(%arg0: i32) -> (i32, i32, i32) {
    %c0_i32 = arith.constant 0 : i32
    %c0_i32_0 = arith.constant 0 : i32
    %c0_i32_1 = arith.constant 0 : i32
    return %arg0, %c0_i32, %c0_i32_0 : i32, i32, i32
  }
  func.func @transform_1(%arg0: i32) -> (i32, i32) {
    %c0_i32 = arith.constant 0 : i32
    %c0_i32_0 = arith.constant 0 : i32
    %c0_i32_1 = arith.constant 0 : i32
    return %c0_i32, %c0_i32_0 : i32, i32
  }
  func.func @transform_2(%arg0: i32) -> (i32, i32) {
    %c0_i32 = arith.constant 0 : i32
    %c0_i32_0 = arith.constant 0 : i32
    %c0_i32_1 = arith.constant 0 : i32
    return %c0_i32, %c0_i32_0 : i32, i32
  }
  func.func @transform_3(%arg0: i32) -> (i32, i32, i32) {
    %c0_i32 = arith.constant 0 : i32
    %c0_i32_0 = arith.constant 0 : i32
    %c0_i32_1 = arith.constant 0 : i32
    return %arg0, %c0_i32, %c0_i32_0 : i32, i32, i32
  }
  func.func @transform_4(%arg0: i32) -> (i32, i32, i32) {
    %c0_i32 = arith.constant 0 : i32
    %c0_i32_0 = arith.constant 0 : i32
    %c0_i32_1 = arith.constant 0 : i32
    return %arg0, %c0_i32, %c0_i32_0 : i32, i32, i32
  }
}

</mosaic_0001>

<bundles_post_ra>
// kernel: tpu_custom_call.1
= control target key start
LH: loop header
LB: loop body
LE: loop exit
PB: predicated region body
PF: predicated region fallthrough
CT: control target
= control target key end

     0   :  { %10 = vsyncpa [#allocation3], 0  ;;  %s1570_s0 = inlined_call_operand.vmem [shape: bf16[2,4,768], index: 0, kind: input, shape index: {}]   ;;  %s1571_s1 = inlined_call_operand.vmem [shape: bf16[768,4], index: 1, kind: input, shape index: {}]   ;;  %s1572_s2 = inlined_call_operand.vmem [shape: f32[1,4], index: 2, kind: input, shape index: {}]   ;;  %s1573_s3 = inlined_call_operand.hbm [shape: f32[2,1,2], index: 3, kind: output, shape index: {0}]   ;;  %s1574_s4 = inlined_call_operand.hbm [shape: f32[2,1,2], index: 4, kind: output, shape index: {1}]  }
   0x1   :  { %12 = vsyncpa [#allocation3 + $0x1], 0 }
   0x2   :  { %13 = vsyncpa [#allocation5], 0 }
   0x3   :  { %15 = vsyncpa [#allocation5 + $0x1], 0  ;;  %s1271_s15 = smov 0   ;;  %s1273_s16 = smov 0  }
   0x4   :  { %s1275_s17 = smov 0   ;;  %s1277_s18 = smov 0  }
   0x5 LB: > { %s1292_s19 = sadd.s32 4294967295, %s1240_s18   ;;  %s917_s20 = sadd.s32 4294967294, %s1240_s18   ;;  %s1240_s18 = sphi %s1277_s18, %s1580_s18   ;;  %s1236_s17 = sphi %s1275_s17, %s1579_s17   ;;  %s1232_s16 = sphi %s1273_s16, %s1578_s16   ;;  %s1228_s15 = sphi %s1271_s15, %s1577_s15  }
   0x6   : > { %s1296_s21 = sadd.s32 1, %s1240_s18   ;;  %s96_s22 = sadd.s32 1, %s1236_s17 }
   0x7   : > { %s93_s23 = ssub.s32 %s1240_s18, %s1296_s21  ;;  %p106_p0 = scmp.ne.s32.totalorder %s1236_s17, %s1232_s16 }
   0x8   : > { %p94_p1 = scmp.eq.s32.totalorder %s93_s23, 0  ;;  %p107_p2 = scmp.eq.s32.totalorder %s1292_s19, 1 }
   0x9   : > { %p112_p3 = scmp.ne.s32.totalorder %s1232_s16, %s1228_s15  ;;  %p113_p4 = scmp.eq.s32.totalorder %s917_s20, 1 }
   0xa   : > { %s1307_s24 = scalar_select %p94_p1, %s1236_s17, %s96_s22  }
   0xb   : > { %p1309_p5 = por %p107_p2, %p106_p0  ;;  %p1313_p6 = por %p113_p4, %p112_p3 }
   0xc   : > { %p920_p7 = scmp.ge.s32.totalorder %s1240_s18, 1  ;;  %p171_p8 = scmp.lt.s32.totalorder %s1240_s18, 3 }
   0xe   : > { %p172_p9 = pnand %p920_p7, %p171_p8 }
   0xf   : > { %v1089_v0 = vld [vmem:[%s1571_s1 + $0x40] sm:$0xff] (!%p172_p9)   ;;  %v1093_v4 = vld [vmem:[%s1571_s1 + $0x48] sm:$0xff] (!%p172_p9)   ;;  %v1097_v8 = vld [vmem:[%s1571_s1 + $0x50] sm:$0xff] (!%p172_p9)   ;;  %p200_p10 = scmp.lt.s32.totalorder (!%p172_p9), %s1292_s19, 1  ;;  %v317_v27 = vlaneseq (!%p172_p9)  ;;  %v1242_v35 = vmov (!%p172_p9), 1983009808  }
  0x10   : > { %175 = sbr.rel (%p172_p9) target bundleno = 870 (0x366), region = 32  ;;  %v1090_v1 = vld [vmem:[%s1571_s1] sm:$0xff] (!%p172_p9)   ;;  %976 = vmatprep.subr.bf16.mxu0 (!%p172_p9), %v1089_v0  ;;  %v1094_v5 = vld [vmem:[%s1571_s1 + $0x8] sm:$0xff] (!%p172_p9)   ;;  %v1098_v9 = vld [vmem:[%s1571_s1 + $0x10] sm:$0xff] (!%p172_p9)   ;;  %v315_v36 = vunpack.c.l.s4 (!%p172_p9), %v1242_v35  ;;  %vm775_vm0 = vcmask (!%p172_p9), 27664   ;;  %vm752_vm1 = vcmask (!%p172_p9), 11264  }
  0x11   : > { %v1091_v2 = vld [vmem:[%s1571_s1 + $0xc0] sm:$0xff] (!%p172_p9)   ;;  %977 = vmatpush3.bf16.msra.mxu0 (!%p172_p9), %v1090_v1  ;;  %v1095_v6 = vld [vmem:[%s1571_s1 + $0xc8] sm:$0xff] (!%p172_p9)   ;;  %v1099_v10 = vld [vmem:[%s1571_s1 + $0xd0] sm:$0xff] (!%p172_p9)   ;;  %v318_v32 = vshrl.u32 (!%p172_p9), %v317_v27, 7  ;;  %s1243_s29 = smov (!%p172_p9), 126   ;;  %s1483_s30 = sand.u32 (!%p172_p9), 1, %s1232_s16  }
  0x12   : > { %v1092_v3 = vld [vmem:[%s1571_s1 + $0x80] sm:$0xff] (!%p172_p9)   ;;  %998 = vmatprep.subr.bf16.mxu1 (!%p172_p9), %v1091_v2  ;;  %978 = vmatprep.subr.bf16.mxu0 (!%p172_p9), %v1093_v4  ;;  %v1096_v7 = vld [vmem:[%s1571_s1 + $0x88] sm:$0xff] (!%p172_p9)   ;;  %v1100_v11 = vld [vmem:[%s1571_s1 + $0x90] sm:$0xff] (!%p172_p9)   ;;  %v316_v38 = vunpack.c.0.s8 (!%p172_p9), %v315_v36  ;;  %s193_s5 = scalar_lea.vmem (!%p172_p9), [#allocation2], %s1483_s30  ;;  %vm773_vm2 = vcmask (!%p172_p9), 8192   ;;  %s1244_s13 = smov (!%p172_p9), [#allocation2]  }
  0x13   : > { %999 = vmatpush3.bf16.msra.mxu1 (!%p172_p9), %v1092_v3  ;;  %v1101_v12 = vld [vmem:[%s1571_s1 + $0x58] sm:$0xff] (!%p172_p9)   ;;  %v1105_v16 = vld [vmem:[%s1571_s1 + $0x60] sm:$0xff] (!%p172_p9)   ;;  %v1109_v20 = vld [vmem:[%s1571_s1 + $0x68] sm:$0xff] (!%p172_p9)   ;;  %s821_s6 = sshll.u32 (!%p172_p9), %s193_s5, 4  ;;  %s1150_s14 = sshll.u32 (!%p172_p9), %s1244_s13, 4  ;;  %s1495_s6 = int_to_ptr.vmem [resolvable:$true] %s821_s6  ;;  %s1151_s14 = int_to_ptr.vmem [resolvable:$false] %s1150_s14 }
  0x14   : > { %1000 = vmatprep.subr.bf16.mxu1 (!%p172_p9), %v1095_v6  ;;  %v1102_v13 = vld [vmem:[%s1571_s1 + $0x18] sm:$0xff] (!%p172_p9)   ;;  %v1106_v17 = vld [vmem:[%s1571_s1 + $0x20] sm:$0xff] (!%p172_p9)   ;;  %v1110_v21 = vld [vmem:[%s1571_s1 + $0x28] sm:$0xff] (!%p172_p9)   ;;  %v319_v40 = vsub.s32 (!%p172_p9), %v316_v38, %v318_v32  ;;  %s1146_s11 = scalar_lea.vmem (!%p172_p9), %s1495_s6, 16  ;;  %s1152_s20 = scalar_lea.vmem (!%p172_p9), %s1151_s14, 32 }
  0x15   : > { %979 = vmatpush3.bf16.msra.mxu0 (!%p172_p9), %v1094_v5  ;;  %v1103_v14 = vld [vmem:[%s1571_s1 + $0xd8] sm:$0xff] (!%p172_p9)   ;;  %v1107_v18 = vld [vmem:[%s1571_s1 + $0xe0] sm:$0xff] (!%p172_p9)   ;;  %v1111_v22 = vld [vmem:[%s1571_s1 + $0xe8] sm:$0xff] (!%p172_p9)   ;;  %p1147_p11 = scmp.ne.s32.totalorder (!%p172_p9), %s1495_s6, %s1146_s11  ;;  %p1153_p0 = scmp.lt.s32.totalorder (!%p172_p9), %s1495_s6, %s1151_s14 }
  0x16   : > { %980 = vmatprep.subr.bf16.mxu0 (!%p172_p9), %v1097_v8  ;;  %v1104_v15 = vld [vmem:[%s1571_s1 + $0x98] sm:$0xff] (!%p172_p9)   ;;  %v1108_v19 = vld [vmem:[%s1571_s1 + $0xa0] sm:$0xff] (!%p172_p9)   ;;  %v1112_v23 = vld [vmem:[%s1571_s1 + $0xa8] sm:$0xff] (!%p172_p9)   ;;  %p1154_p1 = scmp.lt.s32.totalorder (!%p172_p9), %s1152_s20, %s1146_s11 }
  0x17   : > { %1001 = vmatpush3.bf16.msra.mxu1 %v1096_v7  ;;  %s201_s9 = scalar_select %p200_p10, %s1292_s19, 1  ;;  %v1113_v24 = vld [vmem:[%s1571_s1 + $0x70] sm:$0xff]   ;;  %v1117_v29 = vld [vmem:[%s1571_s1 + $0x78] sm:$0xff]   ;;  %v1121_v37 = vld [vmem:[%s1571_s1 + $0x140] sm:$0xff]  }
  0x18   : > { %1002 = vmatprep.subr.bf16.mxu1 %v1099_v10  ;;  %v1114_v25 = vld [vmem:[%s1571_s1 + $0x30] sm:$0xff]   ;;  %v1118_v30 = vld [vmem:[%s1571_s1 + $0x38] sm:$0xff]   ;;  %v1123_v45 = vld [vmem:[%s1571_s1 + $0x100] sm:$0xff]   ;;  %p1148_p12 = pnand %p1147_p11, %p1309_p5  ;;  %p1155_p2 = por %p1154_p1, %p1153_p0 }
  0x19   : > { %981 = vmatpush3.bf16.msra.mxu0 %v1098_v9  ;;  %s1042_s27 = smul.u32 12, %s201_s9  ;;  %v1115_v26 = vld [vmem:[%s1571_s1 + $0xf0] sm:$0xff]   ;;  %v1119_v31 = vld [vmem:[%s1571_s1 + $0xf8] sm:$0xff]   ;;  %v1124_v46 = vld [vmem:[%s1571_s1 + $0x148] sm:$0xff]   ;;  %s805_s9 = scalar_lea.sflag [#allocation3], %s1483_s30 }
  0x1a   : > { %982 = vmatprep.subr.bf16.mxu0 %v1101_v12  ;;  %v1116_v28 = vld [vmem:[%s1571_s1 + $0xb0] sm:$0xff]   ;;  %v1120_v34 = vld [vmem:[%s1571_s1 + $0xb8] sm:$0xff]   ;;  %v1125_v47 = vld [vmem:[%s1571_s1 + $0x108] sm:$0xff]   ;;  %p1149_p13 = pneg %p1148_p12 }
  0x1b   : > { %1003 = vmatpush3.bf16.msra.mxu1 %v1100_v11  ;;  %s1411_s12 = scalar_lea.vmem %s1570_s0, %s1042_s27  ;;  %v1126_v48 = vld [vmem:[%s1571_s1 + $0x150] sm:$0xff]   ;;  %v1128_v51 = vld [vmem:[%s1571_s1 + $0x158] sm:$0xff]   ;;  %v1130_v54 = vld [vmem:[%s1571_s1 + $0x160] sm:$0xff]  }
  0x1c   : > { %1004 = vmatprep.subr.bf16.mxu1 %v1103_v14  ;;  %v206_v33 = vld [vmem:[%s1411_s12] sm:$0xff]  ;;  %v1127_v49 = vld [vmem:[%s1571_s1 + $0x110] sm:$0xff]   ;;  %v923_v50 = vld.sshfl [vmem:[%s1411_s12 + $0x8] sm:$0x33 pattern:$0x76325410]  ;;  %p1156_p3 = pnand %p1155_p2, %p1149_p13 }
  0x1d   : > { %983 = vmatpush3.bf16.msra.mxu0 %v1102_v13  ;;  %v313_v39 = vcombine.high %v206_v33, %v206_v33  ;;  %v320_v41 = vrot.slane %v206_v33, %v319_v40  ;;  %v337_v52 = vcombine.high %v923_v50, %v923_v50  ;;  %v1129_v53 = vld [vmem:[%s1571_s1 + $0x118] sm:$0xff]   ;;  %v1131_v55 = vld [vmem:[%s1571_s1 + $0x120] sm:$0xff]   ;;  %v1132_v56 = vld [vmem:[%s1571_s1 + $0x168] sm:$0xff]   ;;  %s972_s12 = sshll.u32 %s1292_s19, 4 }
  0x1e   : > { %984 = vmatprep.subr.bf16.mxu0 %v1105_v16  ;;  %v1133_v57 = vld [vmem:[%s1571_s1 + $0x128] sm:$0xff]   ;;  %v1134_v58 = vld [vmem:[%s1571_s1 + $0x170] sm:$0xff]   ;;  %v1136_v60 = vld [vmem:[%s1571_s1 + $0x178] sm:$0xff]   ;;  %s1493_s10 = scalar_lea.hbm %s1573_s3, %s972_s12 }
  0x1f   : > { %1005 = vmatpush3.bf16.msra.mxu1 %v1104_v15  ;;  %v327_v42 = vrot.slane %v313_v39, %v319_v40  ;;  %v328_v43 = vcombine.high %v320_v41, %v320_v41  ;;  %v1135_v59 = vld [vmem:[%s1571_s1 + $0x130] sm:$0xff]   ;;  %v1137_v61 = vld [vmem:[%s1571_s1 + $0x138] sm:$0xff]   ;;  %v922_v0 = vld [vmem:[%s1572_s2] ss:$0 sm:$0xff] }
  0x20   : > { %1006 = vmatprep.subr.bf16.mxu1 %v1107_v18 }
  0x21   : > { %985 = vmatpush3.bf16.msra.mxu0 %v1106_v17  ;;  %v329_v44 = vcombine.high %v327_v42, %v327_v42  ;;  %664 = vmatprep.mubr.bf16.mxu0 %v328_v43 }
  0x22   : > { %986 = vmatprep.subr.bf16.mxu0 %v1109_v20 }
  0x23   : > { %1007 = vmatpush3.bf16.msra.mxu1 %v1108_v19  ;;  %704 = vmatprep.mubr.bf16.mxu1 %v329_v44 }
  0x24   : > { %1008 = vmatprep.subr.bf16.mxu1 %v1111_v22 }
  0x25   : > { %987 = vmatpush3.bf16.msra.mxu0 %v1110_v21 }
  0x26   : > { %988 = vmatprep.subr.bf16.mxu0 %v1113_v24 }
  0x27   : > { %1009 = vmatpush3.bf16.msra.mxu1 %v1112_v23 }
  0x28   : > { %1010 = vmatprep.subr.bf16.mxu1 %v1115_v26 }
  0x29   : > { %989 = vmatpush3.bf16.msra.mxu0 %v1114_v25 }
  0x2a   : > { %990 = vmatprep.subr.bf16.mxu0 %v1117_v29 }
  0x2b   : > { %1011 = vmatpush3.bf16.msra.mxu1 %v1116_v28 }
  0x2c   : > { %1012 = vmatprep.subr.bf16.mxu1 %v1119_v31 }
  0x2d   : > { %991 = vmatpush3.bf16.msra.mxu0 %v1118_v30 }
  0x2e   : > { %1020 = vmatprep.subr.bf16.mxu0 %v1121_v37 }
  0x2f   : > { %1013 = vmatpush3.bf16.msra.mxu1 %v1120_v34 }
  0x30   : > { %665 = vmatmul.mubr.bf16.vlgmr.msra.gmra.mrb[0].mxu0 %v320_v41 }
  0x31   : > { %1021 = vmatpush3.bf16.msra.mxu0 %v1123_v45  ;;  %744 = vmatprep.mubr.bf16.mxu0 %v337_v52 }
  0x32   : > { %705 = vmatmul.mubr.bf16.vlgmr.msra.gmra.mrb[0].mxu1 %v327_v42  ;;  %1022 = vmatprep.subr.bf16.mxu0 %v1124_v46 }
  0x35   : > { %1023 = vmatpush3.bf16.msra.mxu0 %v1125_v47 }
  0x36   : > { %1024 = vmatprep.subr.bf16.mxu0 %v1126_v48 }
  0x39   : > { %1025 = vmatpush3.bf16.msra.mxu0 %v1127_v49 }
  0x3a   : > { %1026 = vmatprep.subr.bf16.mxu0 %v1128_v51 }
  0x3d   : > { %1027 = vmatpush3.bf16.msra.mxu0 %v1129_v53 }
  0x3e   : > { %1028 = vmatprep.subr.bf16.mxu0 %v1130_v54 }
  0x41   : > { %1029 = vmatpush3.bf16.msra.mxu0 %v1131_v55 }
  0x42   : > { %1030 = vmatprep.subr.bf16.mxu0 %v1132_v56 }
  0x45   : > { %1031 = vmatpush3.bf16.msra.mxu0 %v1133_v57 }
  0x46   : > { %1032 = vmatprep.subr.bf16.mxu0 %v1134_v58 }
  0x49   : > { %1033 = vmatpush3.bf16.msra.mxu0 %v1135_v59 }
  0x4a   : > { %1034 = vmatprep.subr.bf16.mxu0 %v1136_v60 }
  0x4d   : > { %1035 = vmatpush3.bf16.msra.mxu0 %v1137_v61 }
  0x50   : > { %745 = vmatmul.mubr.bf16.vlgmr.msra.gmra.mrb[4].mxu0 %v923_v50 }
 0x103   : > { %v992_v62 = vpop.f32.mrb[0].mxu0 }
 0x104   : > { %v993_v1 = vpop.f32.mrb[1].mxu0 }
 0x105   : > { %v1014_v63 = vpop.f32.mrb[0].mxu1  ;;  %v994_v3 = vadd.f32 %v993_v1, %v992_v62  ;;  %v995_v4 = vpop.f32.mrb[2].mxu0 }
 0x106   : > { %v1015_v2 = vpop.f32.mrb[1].mxu1  ;;  %v996_v7 = vpop.f32.mrb[3].mxu0 }
 0x107   : > { %v1016_v5 = vadd.f32 %v1015_v2, %v1014_v63  ;;  %v1017_v6 = vpop.f32.mrb[2].mxu1  ;;  %v667_v9 = vadd.f32 %v994_v3, %v922_v0 }
 0x108   : > { %v1018_v8 = vpop.f32.mrb[3].mxu1 }
 0x109   : > { %v707_v10 = vadd.f32 %v1016_v5, %v667_v9 }
 0x123   : > { %v1036_v11 = vpop.f32.mrb[4].mxu0 }
 0x124   : > { %v1037_v12 = vpop.f32.mrb[5].mxu0 }
 0x125   : > { %v1038_v13 = vadd.f32 %v1037_v12, %v1036_v11  ;;  %v1039_v14 = vpop.f32.mrb[6].mxu0 }
 0x126   : > { %v1040_v15 = vpop.f32.mrb[7].mxu0 }
 0x127   : > { %v747_v16 = vadd.f32 %v1038_v13, %v707_v10 }
 0x129   : > { %v776_v17 = vsel %vm775_vm0, %v747_v16, -inf  ;;  %v753_v18 = vsel %vm752_vm1, %v747_v16, -inf }
 0x12a   : > { %777 = vmax.xlane.f32.xlu0 %v776_v17  ;;  %754 = vmax.xlane.f32.xlu1 %v753_v18 }
 0x1b7   : > { %v778_v19 = vpop.xlane.xlu0 %777  ;;  %v755_v23 = vpop.xlane.xlu1 %754 }
 0x1b8   : > { %v779_v20 = vsub.f32 %v747_v16, %v778_v19  ;;  %v756_v24 = vsub.f32 %v747_v16, %v755_v23 }
 0x1ba   : > { %v780_v21 = vmul.f32 1.442695, %v779_v20  ;;  %v757_v25 = vmul.f32 1.442695, %v756_v24 }
 0x1bc   : > { %1138 = vpow2.f32 %v780_v21 }
 0x1bd   : > { %1140 = vpow2.f32 %v757_v25 }
 0x1c6   : > { %v1139_v22 = vpop.eup %1138 }
 0x1c7   : > { %783 = vrot.lane.b32.xlu0 %v1139_v22, %s1243_s29  ;;  %v1141_v28 = vpop.eup %1140 }
 0x1c8   : > { %v759_v29 = vsel %vm752_vm1, %v1141_v28, 0.0 }
 0x239   : > { %v784_v26 = vpop.permute.xlu0 %783 }
 0x23a   : > { %v786_v27 = vsel %vm752_vm1, %v784_v26, 0.0 }
 0x23b   : > { %787 = vadd.xlane.f32.xlu1 %v786_v27 }
 0x23f   : > { %760 = vadd.xlane.f32.xlu1 %v759_v29 }
 0x2c8   : > { %v788_v30 = vpop.xlane.xlu1 %787 }
 0x2c9   : > { %1142 = vrcp.f32 %v788_v30 }
 0x2cc   : > { %v761_v31 = vpop.xlane.xlu1 %760 }
 0x2cd   : > { %1144 = vrcp.f32 %v761_v31 }
 0x2d3   : > { %v1143_v32 = vpop.eup %1142 }
 0x2d4   : > { %v790_v33 = vmul.f32 %v1143_v32, %v1139_v22 }
 0x2d6   : > { %v791_v34 = vsel %vm775_vm0, %v790_v33, 0.0 }
 0x2d7   : > { %v1145_v35 = vpop.eup %1144  ;;  %v792_v36 = vrot.slane %v791_v34, 4 }
 0x2d8   : > { %v763_v37 = vmul.f32 %v1145_v35, %v1141_v28 }
 0x2d9   : > { %v793_v38 = vadd.f32 %v792_v36, %v791_v34 }
 0x2da   : > { %v764_v39 = vsel %vm752_vm1, %v763_v37, 0.0 }
 0x2db   : > { %v794_v40 = vrot.slane %v793_v38, 2  ;;  %v765_v41 = vrot.slane %v764_v39, 4 }
 0x2dd   : > { %v795_v42 = vadd.f32 %v794_v40, %v793_v38  ;;  %v766_v43 = vadd.f32 %v765_v41, %v764_v39 }
 0x2df   : > { %v796_v44 = vrot.slane %v795_v42, 1  ;;  %v767_v45 = vrot.slane %v766_v43, 2 }
 0x2e1   : > { %v797_v46 = vadd.f32 %v796_v44, %v795_v42  ;;  %v768_v47 = vadd.f32 %v767_v45, %v766_v43 }
 0x2e3   : > { %v798_v48 = vmul.f32 0.25, %v797_v46  ;;  %v769_v49 = vrot.slane %v768_v47, 1 }
 0x2e5   : > { %800 = vrot.lane.b32.xlu1 %v798_v48, %s1243_s29  ;;  %v770_v50 = vadd.f32 %v769_v49, %v768_v47 }
 0x2e7   : > { %v772_v51 = vmul.f32 0.25, %v770_v50 }
 0x2e9   : > { %774 = vst.msk [vmem:[%s193_s5] sm:$0x1] %vm773_vm2, %v772_v51 }
 0x2ea   : > { %1159 = shalt.err (!%p1156_p3)
}
 0x2eb   : > { %s1160_s22 = scalar_lea.hbm %s1493_s10, 16  ;;  %s1164_s27 = scalar_lea.hbm %s1573_s3, 32 }
 0x2ec   : > { %p1161_p4 = scmp.ne.s32.totalorder %s1493_s10, %s1160_s22  ;;  %p1165_p9 = scmp.lt.u32.totalorder %s1493_s10, %s1573_s3 }
 0x2ed   : > { %p1166_p10 = scmp.lt.u32.totalorder %s1164_s27, %s1160_s22  ;;  %p1168_p12 = scmp.lt.u32.totalorder %s1160_s22, %s1493_s10 }
 0x2ee   : > { %p1162_p7 = pnand %p1161_p4, %p1309_p5 }
 0x2ef   : > { %p1167_p11 = por %p1166_p10, %p1165_p9 }
 0x2f0   : > { %p1163_p8 = pneg %p1162_p7 }
 0x2f1   : > { %p1169_p13 = por %p1168_p12, %p1167_p11 }
 0x2f3   : > { %p1170_p0 = pnand %p1169_p13, %p1163_p8 }
 0x2f5   : > { %1173 = shalt.err (!%p1170_p0)
}
 0x2f6   : > { %1043 = dma.vmem_to_hbm [thread:$0]  (%p1309_p5), %s1495_s6, 16, %s1493_s10, %s805_s9  }
 0x2f7   : > { %s199_s7 = scalar_lea.vmem [#allocation4], %s1483_s30  ;;  %s1526_s14 = scalar_lea.hbm %s1574_s4, %s972_s12 }
 0x2f8   : > { %s834_s8 = sshll.u32 %s199_s7, 4  ;;  %s809_s20 = scalar_lea.sflag [#allocation5], %s1483_s30  ;;  %s1528_s8 = int_to_ptr.vmem [resolvable:$true] %s834_s8 }
 0x2f9   : > { %s1174_s22 = scalar_lea.vmem %s1528_s8, 16  ;;  %s1245_s19 = smov [#allocation4]  }
 0x2fa   : > { %p1175_p1 = scmp.ne.s32.totalorder %s1528_s8, %s1174_s22  ;;  %s1178_s6 = sshll.u32 %s1245_s19, 4  ;;  %s1179_s6 = int_to_ptr.vmem [resolvable:$false] %s1178_s6 }
 0x2fb   : > { %s1180_s10 = scalar_lea.vmem %s1179_s6, 32  ;;  %p1181_p4 = scmp.lt.s32.totalorder %s1528_s8, %s1179_s6 }
 0x2fc   : > { %p1176_p2 = pnand %p1175_p1, %p1309_p5  ;;  %p1182_p7 = scmp.lt.s32.totalorder %s1180_s10, %s1174_s22 }
 0x2fe   : > { %p1177_p3 = pneg %p1176_p2  ;;  %p1183_p8 = por %p1182_p7, %p1181_p4 }
 0x300   : > { %p1184_p9 = pnand %p1183_p8, %p1177_p3 }
 0x357   : > { %v801_v52 = vpop.permute.xlu1 %800 }
 0x358   : > { %803 = vst.msk [vmem:[%s199_s7] sm:$0x1] %vm773_vm2, %v801_v52 }
 0x359   : > { %1187 = shalt.err (!%p1184_p9)
}
 0x35a   : > { %s1188_s30 = scalar_lea.hbm %s1526_s14, 16  ;;  %s1192_s23 = scalar_lea.hbm %s1574_s4, 32 }
 0x35b   : > { %p1189_p10 = scmp.ne.s32.totalorder %s1526_s14, %s1188_s30  ;;  %p1193_p13 = scmp.lt.u32.totalorder %s1526_s14, %s1574_s4 }
 0x35c   : > { %p1194_p0 = scmp.lt.u32.totalorder %s1192_s23, %s1188_s30  ;;  %p1196_p2 = scmp.lt.u32.totalorder %s1188_s30, %s1526_s14 }
 0x35d   : > { %p1190_p11 = pnand %p1189_p10, %p1309_p5 }
 0x35e   : > { %p1195_p1 = por %p1194_p0, %p1193_p13 }
 0x35f   : > { %p1191_p12 = pneg %p1190_p11 }
 0x360   : > { %p1197_p3 = por %p1196_p2, %p1195_p1 }
 0x362   : > { %p1198_p4 = pnand %p1197_p3, %p1191_p12 }
 0x364   : > { %1201 = shalt.err (!%p1198_p4)
}
 0x365   : > { %1044 = dma.vmem_to_hbm [thread:$0]  (%p1309_p5), %s1528_s8, 16, %s1526_s14, %s809_s20  }
 0x366 PF: > { %p1054_p7 = scmp.ge.s32.totalorder %s1240_s18, 2  ;;  %s846_s29 = sand.u32 1, %s1228_s15  }
 0x367   : > { %s847_s5 = scalar_lea.sflag [#allocation3], %s846_s29 }
 0x368   : > { %p1048_p8 = pnand %p1054_p7, %p1313_p6 }
 0x36a   : > { %1219 = dma.done.wait (!%p1048_p8), %s847_s5, 16  }
 0x36b   : > { %1221 = vsyncadd (!%p1048_p8), %s847_s5, 4294967280  ;;  %s855_s7 = scalar_lea.sflag [#allocation5], %s846_s29 }
 0x36c   : > { %1223 = dma.done.wait (!%p1048_p8), %s855_s7, 16  }
 0x36d   : > { %1225 = vsyncadd (!%p1048_p8), %s855_s7, 4294967280  ;;  %p18_p5 = scmp.ge.s32.totalorder %s1296_s21, 4   ;;  %s1577_s15 = smov %s1232_s16 }
 0x36e   : > { %s1578_s16 = smov %s1236_s17  ;;  %s1579_s17 = smov %s1307_s24 }
 0x36f   : > { %s1580_s18 = smov %s1296_s21  ;;  %20 = sbr.rel (!%p18_p5) target bundleno = 5 (0x5), region = 84 }
 0x376   :  { %859 = vsyncpa [#allocation3], 1 }
 0x377   :  { %861 = vsyncpa [#allocation3 + $0x1], 1 }
 0x378   :  { %862 = vsyncpa [#allocation5], 1 }
 0x379   :  { %864 = vsyncpa [#allocation5 + $0x1], 1 }

</bundles_post_ra>
